<compile_context>
chip_gen: v6e
topology: v6e:2x2x1
jax: 0.10.0
libtpu: 0.0.40
codegen_flags: <defaults>
</compile_context>

<pallas_src>
import functools

import jax
import jax.numpy as jnp
from jax.experimental import pallas as pl
from jax.experimental.pallas import tpu as pltpu


_SQRT_HALF = 0.7071067811865476
_SQRT_2_OVER_PI = 0.7978845608028654


def _round_up(x, m):
    return ((x + m - 1) // m) * m


def _gelu(x, approximate):
    # PyTorch nn.GELU() default is the exact erf formulation.
    # TODO(synk): on v5e (f32-only VALU) the erf polynomial can saturate the VALU
    # slot at small E; pass approximate_gelu=True to move the work to the EUP
    # (tanh) if the numerics change is acceptable.
    if approximate:
        return 0.5 * x * (1.0 + jnp.tanh(_SQRT_2_OVER_PI * (x + 0.044715 * x * x * x)))
    return 0.5 * x * (1.0 + jax.lax.erf(x * _SQRT_HALF))


def projection_head_kernel(x_ref, w1_ref, w2_ref, params_ref, o_ref, acc_ref, *,
                           eps, approximate):
    k = pl.program_id(1)

    @pl.when(k == 0)
    def _():
        acc_ref[...] = jnp.zeros_like(acc_ref)

    # Partial projection: native-dtype operands on the MXU, f32 accumulation.
    acc_ref[...] += jnp.dot(x_ref[...], w1_ref[...],
                            preferred_element_type=jnp.float32)

    @pl.when(k == pl.num_programs(1) - 1)
    def _():
        b1 = params_ref[0:1, :]       # (1, P) f32 rows of the packed param tile
        b2 = params_ref[1:2, :]
        gamma = params_ref[2:3, :]
        beta = params_ref[3:4, :]

        projected = acc_ref[...] + b1                      # f32
        h = _gelu(projected, approximate)                  # f32

        # fc: cast the activation to the weight dtype so bf16 weights run the MXU
        # at native rate; accumulate in f32.
        y = jnp.dot(h.astype(w2_ref.dtype), w2_ref[...],
                    preferred_element_type=jnp.float32) + b2

        # Dropout is identity in eval mode.
        y = y + projected                                  # residual

        # LayerNorm over the projection dimension (f32).
        mean = jnp.mean(y, axis=-1, keepdims=True)
        centered = y - mean
        var = jnp.mean(centered * centered, axis=-1, keepdims=True)
        out = centered * jax.lax.rsqrt(var + eps) * gamma + beta

        o_ref[...] = out.astype(o_ref.dtype)


def _tpu_vmem_capacity():
    try:
        return int(pltpu.get_tpu_info().vmem_capacity_bytes)
    except Exception:
        return 64 * 2**20      # conservative default: v7x per-TensorCore VMEM


def _vmem_bytes_estimate(block_b, tile_k, P, num_k,
                         x_itemsize, w_itemsize, out_itemsize):
    w1_bufs = 1 if num_k == 1 else 2          # resident (Buffered(1)) vs K-streamed
    resident = (w1_bufs * tile_k * P * w_itemsize
                + P * P * w_itemsize          # W2: single buffer (Buffered(1))
                + 8 * P * 4)                  # packed (4,P) f32 params, 8-sublane pad
    streamed = (2 * block_b * tile_k * x_itemsize   # x tile (double-buffered)
                + 2 * block_b * P * out_itemsize)   # output tile (double-buffered)
    scratch = block_b * P * 4                 # f32 accumulator scratch
    intermediates = 3 * block_b * P * 4       # projected / h / y live in VMEM
    return resident + streamed + scratch + intermediates


def _pick_tile_k(E, P, w_itemsize, weight_budget):
    # Keep W1 fully resident when it fits; otherwise stream 128-aligned K tiles.
    if E % 128 != 0 or E * P * w_itemsize <= weight_budget:
        return E
    for tk in (2048, 1024, 512, 256, 128):
        if E % tk == 0 and 2 * tk * P * w_itemsize <= weight_budget:
            return tk
    return 128


def _pick_block_b(B, tile_k, P, num_k, x_itemsize, w_itemsize, out_itemsize,
                  budget, preferred):
    bb = preferred
    while bb > 8 and _vmem_bytes_estimate(bb, tile_k, P, num_k,
                                          x_itemsize, w_itemsize,
                                          out_itemsize) > budget:
        bb //= 2
    if B >= 128:
        # Multiples of 128 rows: full MXU passes, unmasked stores on v5e's vst slot.
        bb = min(bb, _round_up(B, 128))
        bb = max(128, (bb // 128) * 128)
    else:
        bb = min(bb, _round_up(B, 8))
        bb = max(8, _round_up(bb, 8))
    return bb


def projection_head(x, w1, b1, w2, b2, gamma, beta, *, eps=1e-5,
                    block_b=None, block_k=None, approximate_gelu=False):
    """x: [B, E] -> [B, P]. w1: [E, P], w2: [P, P], b1/b2/gamma/beta: [P]."""
    B, E = x.shape
    P = w1.shape[1]
    x_itemsize = jnp.dtype(x.dtype).itemsize
    w_itemsize = jnp.dtype(w1.dtype).itemsize
    out_itemsize = x_itemsize

    cap = _tpu_vmem_capacity()
    # Working-set budget: half the chip's VMEM, at most 64 MiB (headroom for the
    # compiler's own scratch / pipeline bookkeeping).
    budget = min(cap // 2, 64 * 2**20)
    preferred_bb = 512 if cap >= 96 * 2**20 else 256

    # K (embedding) tiling.
    if block_k is None:
        tile_k = _pick_tile_k(E, P, w_itemsize, budget // 2)
    else:
        ok = (E % block_k == 0) and (block_k % 128 == 0 or block_k == E)
        tile_k = block_k if ok else E
    num_k = E // tile_k

    # Batch tiling.
    if block_b is None:
        block_b = _pick_block_b(B, tile_k, P, num_k, x_itemsize, w_itemsize,
                                out_itemsize, budget, preferred_bb)
    else:
        block_b = max(8, _round_up(block_b, 8))

    # Pad only the *input* batch (cheap: E columns).  The output keeps its true
    # shape; Pallas masks the partial final tile's store, so there is no
    # post-kernel out[:B] slice (no extra B*P HBM round trip).
    B_pad = _round_up(B, block_b)
    if B_pad != B:
        x = jnp.pad(x, ((0, B_pad - B), (0, 0)))
    num_b = B_pad // block_b

    # Pack the four (P,) params into one resident f32 tile.
    params = jnp.stack([b1, b2, gamma, beta], axis=0).astype(jnp.float32)  # (4, P)

    # Advisory cost estimate for XLA's scheduler.
    flops = 2 * B_pad * (E * P + P * P)
    bytes_accessed = (B_pad * E * x_itemsize + (E * P + P * P) * w_itemsize
                      + 4 * P * 4 + B * P * out_itemsize)
    cost = pl.CostEstimate(flops=flops, transcendentals=B_pad * P,
                           bytes_accessed=bytes_accessed)

    est = _vmem_bytes_estimate(block_b, tile_k, P, num_k,
                               x_itemsize, w_itemsize, out_itemsize)
    # Budget-derived limit, never more than 3/4 of physical VMEM (<=48 MiB on v7x).
    vmem_limit = int(min(max(est + (8 << 20), 32 << 20), (3 * cap) // 4))
    vmem_limit = int(max(vmem_limit, est))

    resident = functools.partial(pl.BlockSpec, pipeline_mode=pl.Buffered(1))

    if num_k == 1:
        w1_spec = resident((tile_k, P), lambda i, k: (0, 0))   # resident, 1 buffer
    else:
        w1_spec = pl.BlockSpec((tile_k, P), lambda i, k: (k, 0))  # K-streamed

    in_specs = [
        pl.BlockSpec((block_b, tile_k), lambda i, k: (i, k)),  # x tile (streamed)
        w1_spec,                                               # W1
        resident((P, P), lambda i, k: (0, 0)),                 # W2 (resident)
        resident((4, P), lambda i, k: (0, 0)),                 # packed b1/b2/gamma/beta
    ]

    kernel = functools.partial(projection_head_kernel, eps=eps,
                               approximate=approximate_gelu)

    out = pl.pallas_call(
        kernel,
        out_shape=jax.ShapeDtypeStruct((B, P), x.dtype),
        grid_spec=pltpu.PrefetchScalarGridSpec(
            num_scalar_prefetch=0,
            grid=(num_b, num_k),
            in_specs=in_specs,
            out_specs=pl.BlockSpec((block_b, P), lambda i, k: (i, 0)),
            scratch_shapes=[pltpu.VMEM((block_b, P), jnp.float32)],
        ),
        compiler_params=pltpu.CompilerParams(
            dimension_semantics=("parallel", "arbitrary"),
            vmem_limit_bytes=vmem_limit),
        cost_estimate=cost,
    )(x, w1, w2, params)

    return out


def _reference(x, w1, b1, w2, b2, gamma, beta, eps=1e-5):
    projected = x @ w1 + b1
    h = jax.nn.gelu(projected, approximate=False)
    y = h @ w2 + b2
    y = y + projected
    mean = jnp.mean(y, axis=-1, keepdims=True)
    var = jnp.mean((y - mean) ** 2, axis=-1, keepdims=True)
    return (y - mean) * jax.lax.rsqrt(var + eps) * gamma + beta


def _make_params(key, embedding_dim, projection_dim):
    k1, kb1, k2, kb2 = jax.random.split(key, 4)
    lim1 = 1.0 / jnp.sqrt(embedding_dim)
    w1 = jax.random.uniform(k1, (embedding_dim, projection_dim),
                            minval=-lim1, maxval=lim1, dtype=jnp.float32)
    b1 = jax.random.uniform(kb1, (projection_dim,),
                            minval=-lim1, maxval=lim1, dtype=jnp.float32)
    lim2 = 1.0 / jnp.sqrt(projection_dim)
    w2 = jax.random.uniform(k2, (projection_dim, projection_dim),
                            minval=-lim2, maxval=lim2, dtype=jnp.float32)
    b2 = jax.random.uniform(kb2, (projection_dim,),
                            minval=-lim2, maxval=lim2, dtype=jnp.float32)
    gamma = jnp.ones((projection_dim,), dtype=jnp.float32)
    beta = jnp.zeros((projection_dim,), dtype=jnp.float32)
    return w1, b1, w2, b2, gamma, beta


if __name__ == "__main__":
    key = jax.random.PRNGKey(0)
    P = 256   # module default projection_dim

    # Test 1: module-default shapes, single grid step.
    B, E = 8, 32
    kx, kp, key = jax.random.split(key, 3)
    x = jax.random.normal(kx, (B, E), dtype=jnp.float32)
    p = _make_params(kp, E, P)
    out = jax.block_until_ready(projection_head(x, *p))
    ref = _reference(x, *p)
    assert out.shape == (B, P)
    assert jnp.allclose(out, ref, atol=1e-4, rtol=1e-4), "mismatch (test 1)"

    # Test 2: B not a multiple of the tile -> multi-step parallel grid with a
    # masked partial final store (no host-side output slice).
    B2, E2 = 200, 48
    kx2, kp2, key = jax.random.split(key, 3)
    x2 = jax.random.normal(kx2, (B2, E2), dtype=jnp.float32)
    p2 = _make_params(kp2, E2, P)
    out2 = jax.block_until_ready(projection_head(x2, *p2, block_b=64))
    ref2 = _reference(x2, *p2)
    assert out2.shape == (B2, P)
    assert jnp.allclose(out2, ref2, atol=1e-4, rtol=1e-4), "mismatch (test 2)"

    # Test 3: K-tiled path (E streamed in 128-wide tiles, f32 accumulator,
    # pl.when init/finalize on the "arbitrary" K axis).
    B3, E3 = 16, 256
    kx3, kp3, key = jax.random.split(key, 3)
    x3 = jax.random.normal(kx3, (B3, E3), dtype=jnp.float32)
    p3 = _make_params(kp3, E3, P)
    out3 = jax.block_until_ready(projection_head(x3, *p3, block_k=128))
    ref3 = _reference(x3, *p3)
    assert out3.shape == (B3, P)
    assert jnp.allclose(out3, ref3, atol=1e-4, rtol=1e-4), "mismatch (test 3)"

    # Test 4: bf16 activations + weights -> native-rate MXU operands,
    # f32 accumulation / GELU / LayerNorm inside the kernel.
    B4, E4 = 64, 64
    kx4, kp4, key = jax.random.split(key, 3)
    x4 = jax.random.normal(kx4, (B4, E4), dtype=jnp.float32).astype(jnp.bfloat16)
    p4 = tuple(a.astype(jnp.bfloat16) for a in _make_params(kp4, E4, P))
    out4 = jax.block_until_ready(projection_head(x4, *p4))
    ref4 = _reference(x4.astype(jnp.float32),
                      *(a.astype(jnp.float32) for a in p4))
    assert out4.shape == (B4, P)
    assert jnp.allclose(out4.astype(jnp.float32), ref4, atol=1.5e-1, rtol=1.5e-1), \
        "mismatch (test 4, bf16)"

    print("KERNEL_OK")
</pallas_src>

<mosaic_0001>
module attributes {stable_mosaic.version = 11 : i64} {
  func.func @projection_head_kernel(%arg0: i32, %arg1: i32, %arg2: memref<8x32xf32, #tpu.memory_space<vmem>>, %arg3: memref<32x256xf32, #tpu.memory_space<vmem>>, %arg4: memref<256x256xf32, #tpu.memory_space<vmem>>, %arg5: memref<4x256xf32, #tpu.memory_space<vmem>>, %arg6: memref<8x256xf32, #tpu.memory_space<vmem>>, %arg7: memref<8x256xf32, #tpu.memory_space<vmem>>) attributes {dimension_semantics = [#tpu.dimension_semantics<parallel>, #tpu.dimension_semantics<arbitrary>], iteration_bounds = array<i64: 1, 1>, scalar_prefetch = 0 : i64, scratch_operands = 1 : i64, tpu.core_type = #tpu.core_type<tc>, window_params = [{transform_indices = @transform_0, window_bounds = array<i64: 8, 32>}, {pipeline_mode = #tpu.pipeline_mode<synchronous>, transform_indices = @transform_1, window_bounds = array<i64: 32, 256>}, {pipeline_mode = #tpu.pipeline_mode<synchronous>, transform_indices = @transform_2, window_bounds = array<i64: 256, 256>}, {pipeline_mode = #tpu.pipeline_mode<synchronous>, transform_indices = @transform_3, window_bounds = array<i64: 4, 256>}, {transform_indices = @transform_4, window_bounds = array<i64: 8, 256>}]} {
    %c0_i32 = arith.constant 0 : i32
    %0 = arith.cmpi eq, %arg1, %c0_i32 : i32
    %1 = arith.extui %0 : i1 to i32
    %c0_i32_0 = arith.constant 0 : i32
    %2 = arith.cmpi ne, %1, %c0_i32_0 : i32
    scf.if %2 {
      %cst_10 = arith.constant 0.000000e+00 : f32
      %12 = vector.broadcast %cst_10 : f32 to vector<8x256xf32>
      %c0_11 = arith.constant 0 : index
      %c0_12 = arith.constant 0 : index
      %13 = vector.load %arg7[%c0_11, %c0_12] : memref<8x256xf32, #tpu.memory_space<vmem>>, vector<8x256xf32>
      tpu.vector_store %arg7[%c0_11, %c0_12], %12 {strides = array<i32>} : memref<8x256xf32, #tpu.memory_space<vmem>>, vector<8x256xf32>,
    } else {
    }
    %c0 = arith.constant 0 : index
    %c0_1 = arith.constant 0 : index
    %3 = vector.load %arg7[%c0, %c0_1] : memref<8x256xf32, #tpu.memory_space<vmem>>, vector<8x256xf32>
    %c0_2 = arith.constant 0 : index
    %c0_3 = arith.constant 0 : index
    %4 = vector.load %arg2[%c0_2, %c0_3] : memref<8x32xf32, #tpu.memory_space<vmem>>, vector<8x32xf32>
    %c0_4 = arith.constant 0 : index
    %c0_5 = arith.constant 0 : index
    %5 = vector.load %arg3[%c0_4, %c0_5] : memref<32x256xf32, #tpu.memory_space<vmem>>, vector<32x256xf32>
    %cst = arith.constant dense<0.000000e+00> : vector<8x256xf32>
    %6 = tpu.matmul %4, %5, %cst {dimension_numbers = #tpu.dot_dimension_numbers<[1], [0], [0], [1], [0, 0, 1, 1], [], []>} : vector<8x32xf32>, vector<32x256xf32>, vector<8x256xf32> -> vector<8x256xf32>
    %7 = arith.addf %3, %6 : vector<8x256xf32>
    %c0_6 = arith.constant 0 : index
    %c0_7 = arith.constant 0 : index
    %8 = vector.load %arg7[%c0_6, %c0_7] : memref<8x256xf32, #tpu.memory_space<vmem>>, vector<8x256xf32>
    tpu.vector_store %arg7[%c0_6, %c0_7], %7 {strides = array<i32>} : memref<8x256xf32, #tpu.memory_space<vmem>>, vector<8x256xf32>,
    %c0_i32_8 = arith.constant 0 : i32
    %9 = arith.cmpi eq, %arg1, %c0_i32_8 : i32
    %10 = arith.extui %9 : i1 to i32
    %c0_i32_9 = arith.constant 0 : i32
    %11 = arith.cmpi ne, %10, %c0_i32_9 : i32
    scf.if %11 {
      %c0_10 = arith.constant 0 : index
      %c0_11 = arith.constant 0 : index
      %12 = vector.load %arg5[%c0_10, %c0_11] : memref<4x256xf32, #tpu.memory_space<vmem>>, vector<1x256xf32>
      %c1 = arith.constant 1 : index
      %c0_12 = arith.constant 0 : index
      %13 = vector.load %arg5[%c1, %c0_12] : memref<4x256xf32, #tpu.memory_space<vmem>>, vector<1x256xf32>
      %c2 = arith.constant 2 : index
      %c0_13 = arith.constant 0 : index
      %14 = vector.load %arg5[%c2, %c0_13] : memref<4x256xf32, #tpu.memory_space<vmem>>, vector<1x256xf32>
      %c3 = arith.constant 3 : index
      %c0_14 = arith.constant 0 : index
      %15 = vector.load %arg5[%c3, %c0_14] : memref<4x256xf32, #tpu.memory_space<vmem>>, vector<1x256xf32>
      %c0_15 = arith.constant 0 : index
      %c0_16 = arith.constant 0 : index
      %16 = vector.load %arg7[%c0_15, %c0_16] : memref<8x256xf32, #tpu.memory_space<vmem>>, vector<8x256xf32>
      %17 = vector.broadcast %12 : vector<1x256xf32> to vector<8x256xf32>
      %18 = arith.addf %16, %17 : vector<8x256xf32>
      %cst_17 = arith.constant 5.000000e-01 : f32
      %19 = vector.broadcast %cst_17 : f32 to vector<8x256xf32>
      %20 = arith.mulf %19, %18 : vector<8x256xf32>
      %cst_18 = arith.constant 0.707106769 : f32
      %21 = vector.broadcast %cst_18 : f32 to vector<8x256xf32>
      %22 = arith.mulf %18, %21 : vector<8x256xf32>
      %23 = math.erf %22 : vector<8x256xf32>
      %cst_19 = arith.constant 1.000000e+00 : f32
      %24 = vector.broadcast %cst_19 : f32 to vector<8x256xf32>
      %25 = arith.addf %24, %23 : vector<8x256xf32>
      %26 = arith.mulf %20, %25 : vector<8x256xf32>
      %c0_20 = arith.constant 0 : index
      %c0_21 = arith.constant 0 : index
      %27 = vector.load %arg4[%c0_20, %c0_21] : memref<256x256xf32, #tpu.memory_space<vmem>>, vector<256x256xf32>
      %cst_22 = arith.constant dense<0.000000e+00> : vector<8x256xf32>
      %28 = tpu.matmul %26, %27, %cst_22 {dimension_numbers = #tpu.dot_dimension_numbers<[1], [0], [0], [1], [0, 0, 1, 1], [], []>} : vector<8x256xf32>, vector<256x256xf32>, vector<8x256xf32> -> vector<8x256xf32>
      %29 = vector.broadcast %13 : vector<1x256xf32> to vector<8x256xf32>
      %30 = arith.addf %28, %29 : vector<8x256xf32>
      %31 = arith.addf %30, %18 : vector<8x256xf32>
      %cst_23 = arith.constant dense<0.000000e+00> : vector<8xf32>
      %32 = vector.multi_reduction <add>, %31, %cst_23 [1] : vector<8x256xf32> to vector<8xf32>
      %33 = vector.shape_cast %32 : vector<8xf32> to vector<8x1xf32>
      %cst_24 = arith.constant 2.560000e+02 : f32
      %34 = vector.broadcast %cst_24 : f32 to vector<8x1xf32>
      %35 = arith.divf %33, %34 : vector<8x1xf32>
      %36 = vector.broadcast %35 : vector<8x1xf32> to vector<8x256xf32>
      %37 = arith.subf %31, %36 : vector<8x256xf32>
      %38 = arith.mulf %37, %37 : vector<8x256xf32>
      %cst_25 = arith.constant dense<0.000000e+00> : vector<8xf32>
      %39 = vector.multi_reduction <add>, %38, %cst_25 [1] : vector<8x256xf32> to vector<8xf32>
      %40 = vector.shape_cast %39 : vector<8xf32> to vector<8x1xf32>
      %cst_26 = arith.constant 2.560000e+02 : f32
      %41 = vector.broadcast %cst_26 : f32 to vector<8x1xf32>
      %42 = arith.divf %40, %41 : vector<8x1xf32>
      %cst_27 = arith.constant 9.99999974E-6 : f32
      %43 = vector.broadcast %cst_27 : f32 to vector<8x1xf32>
      %44 = arith.addf %42, %43 : vector<8x1xf32>
      %45 = math.rsqrt %44 : vector<8x1xf32>
      %46 = vector.broadcast %45 : vector<8x1xf32> to vector<8x256xf32>
      %47 = arith.mulf %37, %46 : vector<8x256xf32>
      %48 = vector.broadcast %14 : vector<1x256xf32> to vector<8x256xf32>
      %49 = arith.mulf %47, %48 : vector<8x256xf32>
      %50 = vector.broadcast %15 : vector<1x256xf32> to vector<8x256xf32>
      %51 = arith.addf %49, %50 : vector<8x256xf32>
      %c0_28 = arith.constant 0 : index
      %c0_29 = arith.constant 0 : index
      %52 = vector.load %arg6[%c0_28, %c0_29] : memref<8x256xf32, #tpu.memory_space<vmem>>, vector<8x256xf32>
      tpu.vector_store %arg6[%c0_28, %c0_29], %51 {strides = array<i32>} : memref<8x256xf32, #tpu.memory_space<vmem>>, vector<8x256xf32>,
    } else {
    }
    return
  }
  func.func @transform_0(%arg0: i32, %arg1: i32) -> (i32, i32) {
    %c0_i32 = arith.constant 0 : i32
    return %arg0, %arg1 : i32, i32
  }
  func.func @transform_1(%arg0: i32, %arg1: i32) -> (i32, i32) {
    %c0_i32 = arith.constant 0 : i32
    %c0_i32_0 = arith.constant 0 : i32
    %c0_i32_1 = arith.constant 0 : i32
    return %c0_i32, %c0_i32_0 : i32, i32
  }
  func.func @transform_2(%arg0: i32, %arg1: i32) -> (i32, i32) {
    %c0_i32 = arith.constant 0 : i32
    %c0_i32_0 = arith.constant 0 : i32
    %c0_i32_1 = arith.constant 0 : i32
    return %c0_i32, %c0_i32_0 : i32, i32
  }
  func.func @transform_3(%arg0: i32, %arg1: i32) -> (i32, i32) {
    %c0_i32 = arith.constant 0 : i32
    %c0_i32_0 = arith.constant 0 : i32
    %c0_i32_1 = arith.constant 0 : i32
    return %c0_i32, %c0_i32_0 : i32, i32
  }
  func.func @transform_4(%arg0: i32, %arg1: i32) -> (i32, i32) {
    %c0_i32 = arith.constant 0 : i32
    %c0_i32_0 = arith.constant 0 : i32
    return %arg0, %c0_i32 : i32, i32
  }
}

</mosaic_0001>

<bundles_post_ra>
// kernel: tpu_custom_call.1
= control target key start
LH: loop header
LB: loop body
LE: loop exit
PB: predicated region body
PF: predicated region fallthrough
CT: control target
= control target key end

     0   :  { %9 = vsyncpa [#allocation4], 0  ;;  %s581_s0 = inlined_call_operand.hbm [shape: f32[8,32], index: 0, kind: input, shape index: {}]   ;;  %s582_s1 = inlined_call_operand.hbm [shape: f32[32,256], index: 1, kind: input, shape index: {}]   ;;  %s583_s2 = inlined_call_operand.hbm [shape: f32[256,256], index: 2, kind: input, shape index: {}]   ;;  %s584_s3 = inlined_call_operand.hbm [shape: f32[4,256], index: 3, kind: input, shape index: {}]   ;;  %s585_s4 = inlined_call_operand.hbm [shape: f32[8,256], index: 4, kind: output, shape index: {}]  }
   0x1   :  { %10 = vsyncpa [#allocation7], 0 }
   0x2   :  { %11 = vsyncpa [#allocation10], 0 }
   0x3   :  { %12 = vsyncpa [#allocation5], 0  ;;  %s533_s15 = smov [#allocation6]  }
   0x4   :  { %s28_s16 = sshll.u32 %s533_s15, 4  ;;  %s29_s16 = int_to_ptr.vmem [resolvable:$true] %s28_s16 }
   0x5   :  { %s433_s17 = scalar_lea.vmem %s29_s16, 1024  ;;  %p438_p1 = scmp.lt.s32.totalorder %s29_s16, %s29_s16 }
   0x6   :  { %p434_p0 = scmp.ne.s32.totalorder %s29_s16, %s433_s17  ;;  %p439_p2 = scmp.lt.s32.totalorder %s433_s17, %s433_s17 }
   0x8   :  { %p440_p3 = por %p439_p2, %p438_p1 }
   0xa   :  { %p441_p4 = pnand %p440_p3, %p434_p0 }
   0xc   :  { %444 = shalt.err (!%p441_p4)
}
   0xd   :  { %s534_s18 = smov 256   ;;  %s535_s19 = smov 16  }
   0xe   :  { %34 = dma.hbm_to_vmem [thread:$0]  %s582_s1, 1024, %s29_s16, [#allocation7], %s534_s18, %s534_s18, %s535_s19  }
   0xf   :  { %s536_s22 = smov [#allocation3]   ;;  %s537_s24 = smov [#allocation8]  }
  0x10   :  { %s19_s23 = sshll.u32 %s536_s22, 4  ;;  %s40_s25 = sshll.u32 %s537_s24, 4  ;;  %s20_s23 = int_to_ptr.vmem [resolvable:$true] %s19_s23  ;;  %s41_s25 = int_to_ptr.vmem [resolvable:$true] %s40_s25 }
  0x11   :  { %s453_s26 = scalar_lea.vmem %s20_s23, 128  ;;  %p458_p6 = scmp.lt.s32.totalorder %s20_s23, %s20_s23 }
  0x12   :  { %p454_p5 = scmp.ne.s32.totalorder %s20_s23, %s453_s26  ;;  %p459_p7 = scmp.lt.s32.totalorder %s453_s26, %s453_s26 }
  0x14   :  { %p460_p8 = por %p459_p7, %p458_p6 }
  0x16   :  { %p461_p9 = pnand %p460_p8, %p454_p5 }
  0x18   :  { %464 = shalt.err (!%p461_p9)
}
  0x19   :  { %22 = dma.hbm_to_vmem [thread:$0]  %s581_s0, 128, %s20_s23, [#allocation4]  }
  0x1a   :  { %s473_s29 = scalar_lea.vmem %s41_s25, 8192  ;;  %p478_p11 = scmp.lt.s32.totalorder %s41_s25, %s41_s25 }
  0x1b   :  { %p474_p10 = scmp.ne.s32.totalorder %s41_s25, %s473_s29  ;;  %p479_p12 = scmp.lt.s32.totalorder %s473_s29, %s473_s29 }
  0x1d   :  { %p480_p13 = por %p479_p12, %p478_p11 }
  0x1f   :  { %p481_p0 = pnand %p480_p13, %p474_p10 }
  0x21   :  { %484 = shalt.err (!%p481_p0)
}
  0x22   :  { %46 = dma.hbm_to_vmem [thread:$0]  %s583_s2, 8192, %s41_s25, [#allocation7], %s534_s18, %s534_s18, %s535_s19  }
  0x23   :  { %s538_s5 = smov [#allocation9]  }
  0x24   :  { %s53_s6 = sshll.u32 %s538_s5, 4  ;;  %s54_s6 = int_to_ptr.vmem [resolvable:$true] %s53_s6 }
  0x25   :  { %s493_s7 = scalar_lea.vmem %s54_s6, 128  ;;  %p498_p2 = scmp.lt.s32.totalorder %s54_s6, %s54_s6 }
  0x26   :  { %p494_p1 = scmp.ne.s32.totalorder %s54_s6, %s493_s7  ;;  %p499_p3 = scmp.lt.s32.totalorder %s493_s7, %s493_s7 }
  0x28   :  { %p500_p4 = por %p499_p3, %p498_p2 }
  0x2a   :  { %p501_p5 = pnand %p500_p4, %p494_p1 }
  0x2c   :  { %504 = shalt.err (!%p501_p5)
}
  0x2d   :  { %56 = dma.hbm_to_vmem [thread:$0]  %s584_s3, 128, %s54_s6, [#allocation10]  }
  0x2e   :  { %525 = dma.done.wait [#allocation4], 128  }
  0x2f   :  { %526 = vsyncadd [#allocation4], 4294967168 }
  0x30   :  { %527 = dma.done.wait [#allocation7], 9216  }
  0x31   :  { %528 = vsyncadd [#allocation7], 4294958080 }
  0x32   :  { %529 = dma.done.wait [#allocation10], 128  }
  0x33   :  { %530 = vsyncadd [#allocation10], 4294967168  ;;  %v539_v0 = vmov 0.0   ;;  %v85_v1 = vld [vmem:[#allocation6 + $0x38] sm:$0xff]  ;;  %v84_v2 = vld [vmem:[#allocation6 + $0x30] sm:$0xff]  ;;  %vm86_vm0 = vcmask 261120  }
  0x34   :  { %154 = vmatprep.mubr.f32.mxu0 %v539_v0  ;;  %v83_v3 = vld [vmem:[#allocation6 + $0x28] sm:$0xff]  ;;  %114 = vmatprep.subr.mxu0 %v85_v1  ;;  %v82_v4 = vld [vmem:[#allocation6 + $0x20] sm:$0xff]  ;;  %v81_v5 = vld [vmem:[#allocation6 + $0x18] sm:$0xff]  ;;  %s540_s2 = smov [#allocation11]  }
  0x35   :  { %115 = vmatpush1.msra.mxu0 %v84_v2  ;;  %v80_v6 = vld [vmem:[#allocation6 + $0x10] sm:$0xff]  ;;  %v231_v7 = vld [vmem:[#allocation8 + $0xf8] sm:$0xff]  ;;  %v229_v9 = vld [vmem:[#allocation8 + $0xe8] sm:$0xff]  ;;  %s399_s3 = sshll.u32 %s540_s2, 4  ;;  %s400_s3 = int_to_ptr.vmem [resolvable:$true] %s399_s3 }
  0x36   :  { %116 = vmatprep.subr.mxu0 %v83_v3  ;;  %v230_v8 = vld [vmem:[#allocation8 + $0xf0] sm:$0xff]  ;;  %v79_v10 = vld [vmem:[#allocation6 + $0x8] sm:$0xff]  ;;  %275 = vmatprep.subr.mxu1 %v231_v7  ;;  %v228_v11 = vld [vmem:[#allocation8 + $0xe0] sm:$0xff]  ;;  %s505_s9 = scalar_lea.vmem %s400_s3, 256  ;;  %p510_p7 = scmp.lt.s32.totalorder %s400_s3, %s400_s3 }
  0x37   :  { %117 = vmatpush1.msra.mxu0 %v82_v4  ;;  %v78_v12 = vld [vmem:[#allocation6] sm:$0xff]  ;;  %276 = vmatpush1.msra.mxu1 %v230_v8  ;;  %v227_v13 = vld [vmem:[#allocation8 + $0xd8] sm:$0xff]  ;;  %v226_v15 = vld [vmem:[#allocation8 + $0xd0] sm:$0xff]  ;;  %p506_p6 = scmp.ne.s32.totalorder %s400_s3, %s505_s9  ;;  %p511_p8 = scmp.lt.s32.totalorder %s505_s9, %s505_s9 }
  0x38   :  { %118 = vmatprep.subr.mxu0 %v81_v5  ;;  %v77_v14 = vld [vmem:[#allocation3] sm:$0xff]  ;;  %277 = vmatprep.subr.mxu1 %v229_v9  ;;  %v225_v16 = vld [vmem:[#allocation8 + $0xc8] sm:$0xff]  ;;  %v224_v17 = vld [vmem:[#allocation8 + $0xc0] sm:$0xff] }
  0x39   :  { %119 = vmatpush1.msra.mxu0 %v80_v6  ;;  %278 = vmatpush1.msra.mxu1 %v228_v11  ;;  %v223_v18 = vld [vmem:[#allocation8 + $0xb8] sm:$0xff]  ;;  %v222_v19 = vld [vmem:[#allocation8 + $0xb0] sm:$0xff]  ;;  %v221_v20 = vld [vmem:[#allocation8 + $0xa8] sm:$0xff]  ;;  %p512_p9 = por %p511_p8, %p510_p7 }
  0x3a   :  { %120 = vmatprep.subr.mxu0 %v79_v10  ;;  %279 = vmatprep.subr.mxu1 %v227_v13  ;;  %v220_v21 = vld [vmem:[#allocation8 + $0xa0] sm:$0xff]  ;;  %v219_v22 = vld [vmem:[#allocation8 + $0x98] sm:$0xff]  ;;  %v218_v23 = vld [vmem:[#allocation8 + $0x90] sm:$0xff]  ;;  %v178_v10 = vlaneseq }
  0x3b   :  { %121 = vmatpush1.msra.mxu0 %v78_v12  ;;  %280 = vmatpush1.msra.mxu1 %v226_v15  ;;  %v217_v24 = vld [vmem:[#allocation8 + $0x88] sm:$0xff]  ;;  %v216_v25 = vld [vmem:[#allocation8 + $0x80] sm:$0xff]  ;;  %v215_v26 = vld [vmem:[#allocation8 + $0x78] sm:$0xff]  ;;  %p513_p10 = pnand %p512_p9, %p506_p6 }
  0x3c   :  { %410 = vmatmul.mubr.msk.f32.vlgmr.msra.gmra.mxu0 %vm86_vm0, %v77_v14  ;;  %281 = vmatprep.subr.mxu1 %v225_v16  ;;  %v214_v27 = vld [vmem:[#allocation8 + $0x70] sm:$0xff]  ;;  %v213_v28 = vld [vmem:[#allocation8 + $0x68] sm:$0xff]  ;;  %v212_v29 = vld [vmem:[#allocation8 + $0x60] sm:$0xff]  ;;  %v179_v11 = vshrl.u32 %v178_v10, 7 }
  0x3d   :  { %282 = vmatpush1.msra.mxu1 %v224_v17  ;;  %v211_v30 = vld [vmem:[#allocation8 + $0x58] sm:$0xff]  ;;  %v210_v31 = vld [vmem:[#allocation8 + $0x50] sm:$0xff]  ;;  %v209_v32 = vld [vmem:[#allocation8 + $0x48] sm:$0xff] }
  0x3e   :  { %283 = vmatprep.subr.mxu1 %v223_v18  ;;  %v208_v33 = vld [vmem:[#allocation8 + $0x40] sm:$0xff]  ;;  %v207_v34 = vld [vmem:[#allocation8 + $0x38] sm:$0xff]  ;;  %v206_v35 = vld [vmem:[#allocation8 + $0x30] sm:$0xff]  ;;  %v180_v12 = vsub.s32 0, %v179_v11  ;;  %v184_v14 = vsub.s32 1, %v179_v11 }
  0x3f   :  { %284 = vmatpush1.msra.mxu1 %v222_v19  ;;  %v205_v36 = vld [vmem:[#allocation8 + $0x28] sm:$0xff]  ;;  %v204_v37 = vld [vmem:[#allocation8 + $0x20] sm:$0xff]  ;;  %v203_v38 = vld [vmem:[#allocation8 + $0x18] sm:$0xff] }
  0x40   :  { %285 = vmatprep.subr.mxu1 %v221_v20  ;;  %v202_v39 = vld [vmem:[#allocation8 + $0x10] sm:$0xff]  ;;  %v201_v40 = vld [vmem:[#allocation8 + $0x8] sm:$0xff]  ;;  %v200_v41 = vld [vmem:[#allocation8] sm:$0xff] }
  0x41   :  { %286 = vmatpush1.msra.mxu1 %v220_v21  ;;  %v263_v42 = vld [vmem:[#allocation8 + $0x1f8] sm:$0xff]  ;;  %v262_v43 = vld [vmem:[#allocation8 + $0x1f0] sm:$0xff]  ;;  %v261_v44 = vld [vmem:[#allocation8 + $0x1e8] sm:$0xff] }
  0x42   :  { %287 = vmatprep.subr.mxu1 %v219_v22  ;;  %v260_v45 = vld [vmem:[#allocation8 + $0x1e0] sm:$0xff]  ;;  %v259_v46 = vld [vmem:[#allocation8 + $0x1d8] sm:$0xff]  ;;  %v258_v47 = vld [vmem:[#allocation8 + $0x1d0] sm:$0xff] }
  0x43   :  { %288 = vmatpush1.msra.mxu1 %v218_v23  ;;  %v257_v48 = vld [vmem:[#allocation8 + $0x1c8] sm:$0xff]  ;;  %v256_v49 = vld [vmem:[#allocation8 + $0x1c0] sm:$0xff]  ;;  %v255_v50 = vld [vmem:[#allocation8 + $0x1b8] sm:$0xff] }
  0x44   :  { %289 = vmatprep.subr.mxu1 %v217_v24  ;;  %v254_v51 = vld [vmem:[#allocation8 + $0x1b0] sm:$0xff]  ;;  %v253_v52 = vld [vmem:[#allocation8 + $0x1a8] sm:$0xff]  ;;  %v252_v53 = vld [vmem:[#allocation8 + $0x1a0] sm:$0xff] }
  0x45   :  { %290 = vmatpush1.msra.mxu1 %v216_v25  ;;  %v251_v54 = vld [vmem:[#allocation8 + $0x198] sm:$0xff]  ;;  %v250_v55 = vld [vmem:[#allocation8 + $0x190] sm:$0xff]  ;;  %v249_v56 = vld [vmem:[#allocation8 + $0x188] sm:$0xff] }
  0x46   :  { %291 = vmatprep.subr.mxu1 %v215_v26  ;;  %v248_v57 = vld [vmem:[#allocation8 + $0x180] sm:$0xff]  ;;  %v247_v58 = vld [vmem:[#allocation8 + $0x178] sm:$0xff]  ;;  %v246_v59 = vld [vmem:[#allocation8 + $0x170] sm:$0xff] }
  0x47   :  { %292 = vmatpush1.msra.mxu1 %v214_v27  ;;  %v245_v60 = vld [vmem:[#allocation8 + $0x168] sm:$0xff]  ;;  %v244_v61 = vld [vmem:[#allocation8 + $0x160] sm:$0xff]  ;;  %v243_v62 = vld [vmem:[#allocation8 + $0x158] sm:$0xff] }
  0x48   :  { %293 = vmatprep.subr.mxu1 %v213_v28  ;;  %v242_v63 = vld [vmem:[#allocation8 + $0x150] sm:$0xff]  ;;  %v241_v0 = vld [vmem:[#allocation8 + $0x148] sm:$0xff]  ;;  %v240_v1 = vld [vmem:[#allocation8 + $0x140] sm:$0xff] }
  0x49   :  { %294 = vmatpush1.msra.mxu1 %v212_v29  ;;  %v239_v2 = vld [vmem:[#allocation8 + $0x138] sm:$0xff]  ;;  %v238_v3 = vld [vmem:[#allocation8 + $0x130] sm:$0xff]  ;;  %v237_v4 = vld [vmem:[#allocation8 + $0x128] sm:$0xff] }
  0x4a   :  { %295 = vmatprep.subr.mxu1 %v211_v30  ;;  %v236_v5 = vld [vmem:[#allocation8 + $0x120] sm:$0xff]  ;;  %v235_v6 = vld [vmem:[#allocation8 + $0x118] sm:$0xff]  ;;  %v234_v7 = vld [vmem:[#allocation8 + $0x110] sm:$0xff] }
  0x4b   :  { %296 = vmatpush1.msra.mxu1 %v210_v31  ;;  %v233_v8 = vld [vmem:[#allocation8 + $0x108] sm:$0xff]  ;;  %v232_v9 = vld [vmem:[#allocation8 + $0x100] sm:$0xff] }
  0x4c   :  { %297 = vmatprep.subr.mxu1 %v209_v32  ;;  %v168_v13 = vld [vmem:[#allocation9] ss:$4 sm:$0x3]  ;;  %v170_v31 = vld [vmem:[#allocation9 + $0x1] ss:$4 sm:$0x3] }
  0x4d   :  { %298 = vmatpush1.msra.mxu1 %v208_v33  ;;  %v181_v15 = vrot.slane %v168_v13, %v180_v12  ;;  %v185_v16 = vrot.slane %v168_v13, %v184_v14  ;;  %v268_v32 = vrot.slane %v170_v31, %v180_v12  ;;  %v272_v33 = vrot.slane %v170_v31, %v184_v14 }
  0x4e   :  { %299 = vmatprep.subr.mxu1 %v207_v34 }
  0x4f   :  { %300 = vmatpush1.msra.mxu1 %v206_v35 }
  0x50   :  { %301 = vmatprep.subr.mxu1 %v205_v36 }
  0x51   :  { %302 = vmatpush1.msra.mxu1 %v204_v37 }
  0x52   :  { %303 = vmatprep.subr.mxu1 %v203_v38 }
  0x53   :  { %304 = vmatpush1.msra.mxu1 %v202_v39 }
  0x54   :  { %305 = vmatprep.subr.mxu1 %v201_v40 }
  0x55   :  { %306 = vmatpush1.msra.mxu1 %v200_v41 }
  0x56   :  { %307 = vmatprep.subr.mxu1 %v263_v42 }
  0x57   :  { %308 = vmatpush2.msra.mxu1 %v262_v43 }
  0x58   :  { %309 = vmatprep.subr.mxu1 %v261_v44 }
  0x59   :  { %310 = vmatpush2.msra.mxu1 %v260_v45 }
  0x5a   :  { %311 = vmatprep.subr.mxu1 %v259_v46 }
  0x5b   :  { %312 = vmatpush2.msra.mxu1 %v258_v47 }
  0x5c   :  { %313 = vmatprep.subr.mxu1 %v257_v48 }
  0x5d   :  { %314 = vmatpush2.msra.mxu1 %v256_v49 }
  0x5e   :  { %315 = vmatprep.subr.mxu1 %v255_v50 }
  0x5f   :  { %316 = vmatpush2.msra.mxu1 %v254_v51  ;;  %v172_v51 = vld [vmem:[#allocation9 + $0x2] ss:$4 sm:$0x3] }
  0x60   :  { %317 = vmatprep.subr.mxu1 %v253_v52  ;;  %v174_v52 = vld [vmem:[#allocation9 + $0x3] ss:$4 sm:$0x3] }
  0x61   :  { %318 = vmatpush2.msra.mxu1 %v252_v53  ;;  %v369_v53 = vrot.slane %v172_v51, %v180_v12 }
  0x62   :  { %319 = vmatprep.subr.mxu1 %v251_v54  ;;  %v373_v54 = vrot.slane %v172_v51, %v184_v14 }
  0x63   :  { %320 = vmatpush2.msra.mxu1 %v250_v55 }
  0x64   :  { %321 = vmatprep.subr.mxu1 %v249_v56 }
  0x65   :  { %322 = vmatpush2.msra.mxu1 %v248_v57 }
  0x66   :  { %323 = vmatprep.subr.mxu1 %v247_v58  ;;  %v382_v58 = vrot.slane %v174_v52, %v180_v12 }
  0x67   :  { %324 = vmatpush2.msra.mxu1 %v246_v59  ;;  %v386_v59 = vrot.slane %v174_v52, %v184_v14 }
  0x68   :  { %325 = vmatprep.subr.mxu1 %v245_v60 }
  0x69   :  { %326 = vmatpush2.msra.mxu1 %v244_v61 }
  0x6a   :  { %327 = vmatprep.subr.mxu1 %v243_v62 }
  0x6b   :  { %328 = vmatpush2.msra.mxu1 %v242_v63 }
  0x6c   :  { %329 = vmatprep.subr.mxu1 %v241_v0 }
  0x6d   :  { %330 = vmatpush2.msra.mxu1 %v240_v1 }
  0x6e   :  { %331 = vmatprep.subr.mxu1 %v239_v2 }
  0x6f   :  { %332 = vmatpush2.msra.mxu1 %v238_v3 }
  0x70   :  { %333 = vmatprep.subr.mxu1 %v237_v4 }
  0x71   :  { %334 = vmatpush2.msra.mxu1 %v236_v5 }
  0x72   :  { %335 = vmatprep.subr.mxu1 %v235_v6 }
  0x73   :  { %336 = vmatpush2.msra.mxu1 %v234_v7 }
  0x74   :  { %337 = vmatprep.subr.mxu1 %v233_v8 }
  0x75   :  { %338 = vmatpush2.msra.mxu1 %v232_v9 }
  0xfc   :  { %v156_v17 = vpop.f32.mrf.mxu0 }
  0xfd   :  { %v188_v18 = vadd.f32 %v181_v15, %v156_v17 }
  0xfe   :  { %v158_v19 = vpop.f32.mrf.mxu0 }
  0xff   :  { %v192_v20 = vmul.f32 0.70710677, %v188_v18  ;;  %v189_v21 = vadd.f32 %v185_v16, %v158_v19  ;;  %v190_v28 = vmul.f32 0.5, %v188_v18 }
 0x101   :  { %419 = verf.f32 %v192_v20  ;;  %v193_v22 = vmul.f32 0.70710677, %v189_v21  ;;  %v191_v26 = vmul.f32 0.5, %v189_v21 }
 0x103   :  { %421 = verf.f32 %v193_v22 }
 0x10e   :  { %v420_v23 = vpop.eup %419 }
 0x10f   :  { %v196_v25 = vadd.f32 1.0, %v420_v23 }
 0x110   :  { %v422_v24 = vpop.eup %421 }
 0x111   :  { %v197_v27 = vadd.f32 1.0, %v422_v24  ;;  %v198_v30 = vmul.f32 %v196_v25, %v190_v28 }
 0x113   :  { %v199_v29 = vmul.f32 %v197_v27, %v191_v26 }
 0x115   :  { %339 = vmatprep.mubr.f32.mxu1 %v199_v29 }
 0x116   :  { %340 = vmatmul.mubr.f32.vlgmr.msra.gmra.mxu1 %v198_v30 }
 0x1d6   :  { %v341_v34 = vpop.f32.mrf.mxu1 }
 0x1d7   :  { %v342_v35 = vadd.f32 %v341_v34, %v268_v32 }
 0x1d8   :  { %v343_v36 = vpop.f32.mrf.mxu1 }
 0x1d9   :  { %v344_v37 = vadd.f32 %v343_v36, %v272_v33  ;;  %v346_v38 = vadd.f32 %v342_v35, %v188_v18 }
 0x1db   :  { %v347_v39 = vadd.f32 %v344_v37, %v189_v21 }
 0x1dd   :  { %v348_v40 = vadd.f32 %v347_v39, %v346_v38 }
 0x1df   :  { %349 = vadd.xlane.f32.xlu0 %v348_v40 }
 0x268   :  { %v350_v41 = vpop.xlane.xlu0 %349 }
 0x269   :  { %v352_v42 = vmul.f32 0.00390625, %v350_v41 }
 0x26b   :  { %v353_v43 = vsub.f32 %v346_v38, %v352_v42  ;;  %v354_v44 = vsub.f32 %v347_v39, %v352_v42 }
 0x26d   :  { %v355_v45 = vmul.f32 %v353_v43, %v353_v43  ;;  %v356_v46 = vmul.f32 %v354_v44, %v354_v44 }
 0x26f   :  { %v357_v47 = vadd.f32 %v356_v46, %v355_v45 }
 0x271   :  { %358 = vadd.xlane.f32.xlu0 %v357_v47 }
 0x2fa   :  { %v359_v48 = vpop.xlane.xlu0 %358 }
 0x2fb   :  { %v360_v49 = vmul.f32 0.00390625, %v359_v48 }
 0x2fd   :  { %v361_v50 = vadd.f32 1e-05, %v360_v49 }
 0x2ff   :  { %423 = vrsqrt.f32 %v361_v50 }
 0x30c   :  { %v424_v55 = vpop.eup %423 }
 0x30d   :  { %v363_v56 = vmul.f32 %v424_v55, %v353_v43  ;;  %v364_v57 = vmul.f32 %v424_v55, %v354_v44 }
 0x30f   :  { %v376_v60 = vmul.f32 %v369_v53, %v363_v56  ;;  %v377_v61 = vmul.f32 %v373_v54, %v364_v57 }
 0x311   :  { %v389_v62 = vadd.f32 %v382_v58, %v376_v60  ;;  %v390_v63 = vadd.f32 %v386_v59, %v377_v61 }
 0x313   :  { %391 = vst [vmem:[#allocation11] sm:$0xff] %v389_v62  ;;  %392 = vst [vmem:[#allocation11 + $0x8] sm:$0xff] %v390_v63 }
 0x314   :  { %516 = shalt.err (!%p513_p10)
}
 0x315   :  { %402 = dma.vmem_to_hbm [thread:$0]  %s400_s3, 256, %s585_s4, [#allocation5]  }
 0x316   :  { %531 = dma.done.wait [#allocation5], 256  }
 0x317   :  { %532 = vsyncadd [#allocation5], 4294967040 }
 0x318   :  { %406 = vsyncpa [#allocation4], 1 }
 0x319   :  { %407 = vsyncpa [#allocation7], 1 }
 0x31a   :  { %408 = vsyncpa [#allocation10], 1 }
 0x31b   :  { %409 = vsyncpa [#allocation5], 1 }

</bundles_post_ra>
